<compile_context>
chip_gen: v6e
topology: v6e:2x2x1
jax: 0.10.0
libtpu: 0.0.40
codegen_flags: <defaults>
</compile_context>

<pallas_src>
import jax
import jax.numpy as jnp
import numpy as np
from jax.experimental import pallas as pl
from jax.experimental.pallas import tpu as pltpu


def _stn_kernel(im_ref, d_ref, out_ref):
    # im_ref : (1, C, H, W)       full (unpadded) image for this batch, f32
    # d_ref  : (1, 1, 2, Ntile)   padded-frame x (row 0) and y (row 1) coords
    # out_ref: (1, 1, C, Ntile)   warped output (channel-major, lane-dense)
    _, C, H, W = im_ref.shape
    n_pix = d_ref.shape[-1]

    d = d_ref[0, 0]                      # (2, Ntile)
    x = d[0:1, :]                        # (1, Ntile) padded-frame x
    y = d[1:2, :]                        # (1, Ntile) padded-frame y

    max_x = W + 1                        # padded-frame width  - 1
    max_y = H + 1                        # padded-frame height - 1
    x0 = jnp.floor(x).astype(jnp.int32)
    y0 = jnp.floor(y).astype(jnp.int32)
    x0c = jnp.clip(x0, 0, max_x)
    x1c = jnp.clip(x0 + 1, 0, max_x)
    y0c = jnp.clip(y0, 0, max_y)
    y1c = jnp.clip(y0 + 1, 0, max_y)

    # Bilinear weights from the *clamped* x1/y1 (mirrors the reference).
    dxw = x1c.astype(jnp.float32) - x    # weight of the x0 column
    dyw = y1c.astype(jnp.float32) - y    # weight of the y0 row

    # Separable one-hots over the *unpadded* columns / rows (padded index j+1).
    # Pad-ring corners match nothing -> contribute zero (padded image is zero).
    # Coinciding clamped corners add their weights, same as the reference.
    xcols = jax.lax.broadcasted_iota(jnp.int32, (W, n_pix), 0) + 1
    wx = (jnp.where(xcols == x0c, dxw, 0.0)
          + jnp.where(xcols == x1c, 1.0 - dxw, 0.0))           # (W, Ntile)
    yrows = jax.lax.broadcasted_iota(jnp.int32, (H, n_pix), 0) + 1
    wy = (jnp.where(yrows == y0c, dyw, 0.0)
          + jnp.where(yrows == y1c, 1.0 - dyw, 0.0))           # (H, Ntile)

    # One fused MXU matmul over all channels: (C*H, W) @ (W, Ntile).
    im_flat = im_ref[0].reshape(C * H, W)
    g = jnp.dot(im_flat, wx, preferred_element_type=jnp.float32)   # (C*H, Ntile)
    g = g.reshape(C, H, n_pix)
    # Row contraction on the VPU + sublane reduce; single (C, Ntile) store.
    out_ref[0, 0] = jnp.sum(wy[None, :, :] * g, axis=1)            # (C, Ntile)


def _pick_row_tile(H, W, target_lanes=2048):
    # Single tile per batch for small images (one fat grid step; fills the
    # 256-wide MXU N dim on v6e/v7x and avoids per-step overhead).
    if H * W <= 2 * target_lanes:
        return H
    # Otherwise: smallest divisor of H whose tile is lane-aligned (multiple of
    # 128 output pixels) and at least `target_lanes` wide.
    candidates = [d for d in range(1, H + 1)
                  if H % d == 0 and (d * W) % 128 == 0]
    for d in candidates:
        if d * W >= target_lanes:
            return d
    return candidates[-1] if candidates else H


def spatial_transformation(moving_image, deformation_matrix, *, row_tile=None):
    """moving_image: (B, H, W, C) float; deformation_matrix: (B, H, W, 2) float."""
    B, H, W, C = moving_image.shape
    if row_tile is None:
        row_tile = _pick_row_tile(H, W)
    assert H % row_tile == 0
    n_tiles = H // row_tile
    n_pix = row_tile * W

    # Layout plumbing once in the wrapper (no jnp.pad, no in-kernel relayout):
    im_chw = jnp.transpose(moving_image, (0, 3, 1, 2)).astype(jnp.float32)   # (B, C, H, W)

    # Fold the base mesh grid and the +1 padded-frame shift into the
    # deformation (fuses with the reshape copy; removes in-kernel div/mod).
    col = jnp.arange(W, dtype=jnp.float32)
    row = jnp.arange(H, dtype=jnp.float32)
    x = deformation_matrix[..., 0].astype(jnp.float32) + col[None, None, :] + 1.0
    y = deformation_matrix[..., 1].astype(jnp.float32) + row[None, :, None] + 1.0
    coords = jnp.stack(
        [x.reshape(B, n_tiles, n_pix), y.reshape(B, n_tiles, n_pix)], axis=2
    )  # (B, n_tiles, 2, n_pix)

    # Per-step VMEM estimate (f32): double-buffered image / coords / output
    # blocks plus the one-hot and gathered intermediates.
    per_step_bytes = 4 * (2 * C * H * W
                          + 2 * 2 * n_pix
                          + 2 * C * n_pix
                          + (W + H + 2 * C * H) * n_pix)
    vmem_limit = int(min(max(2 * per_step_bytes, 32 * 1024 * 1024),
                         64 * 1024 * 1024))

    # Megacore: shard batches, not tiles (sharding tiles duplicates the full
    # image DMA on both TensorCores on v7x).  Single TC chips are unaffected.
    dims = ("parallel", "arbitrary") if B >= 2 else ("parallel", "parallel")

    out = pl.pallas_call(
        _stn_kernel,
        out_shape=jax.ShapeDtypeStruct((B, n_tiles, C, n_pix), jnp.float32),
        grid_spec=pltpu.PrefetchScalarGridSpec(
            num_scalar_prefetch=0,
            grid=(B, n_tiles),
            in_specs=[
                pl.BlockSpec((1, C, H, W), lambda b, t: (b, 0, 0, 0)),
                pl.BlockSpec((1, 1, 2, n_pix), lambda b, t: (b, t, 0, 0)),
            ],
            out_specs=pl.BlockSpec((1, 1, C, n_pix), lambda b, t: (b, t, 0, 0)),
        ),
        compiler_params=pltpu.CompilerParams(
            dimension_semantics=dims,
            vmem_limit_bytes=vmem_limit),
    )(im_chw, coords)

    # (B, n_tiles, C, row_tile*W) -> (B, H, W, C)
    out = out.reshape(B, n_tiles, C, row_tile, W)
    out = jnp.transpose(out, (0, 1, 3, 4, 2)).reshape(B, H, W, C)
    return out


def _reference(moving_image, deformation_matrix):
    """Pure-JAX mirror of the PyTorch forward for validation."""
    im = jnp.pad(moving_image, ((0, 0), (1, 1), (1, 1), (0, 0))).astype(jnp.float32)
    B, Hp, Wp, C = im.shape
    H, W = deformation_matrix.shape[1:3]
    xm = jnp.broadcast_to(jnp.arange(W, dtype=jnp.float32)[None, :], (H, W))
    ym = jnp.broadcast_to(jnp.arange(H, dtype=jnp.float32)[:, None], (H, W))
    x = (deformation_matrix[..., 0] + xm + 1.0).reshape(B, -1)
    y = (deformation_matrix[..., 1] + ym + 1.0).reshape(B, -1)
    x0 = jnp.clip(jnp.floor(x).astype(jnp.int32), 0, Wp - 1)
    x1 = jnp.clip(jnp.floor(x).astype(jnp.int32) + 1, 0, Wp - 1)
    y0 = jnp.clip(jnp.floor(y).astype(jnp.int32), 0, Hp - 1)
    y1 = jnp.clip(jnp.floor(y).astype(jnp.int32) + 1, 0, Hp - 1)

    def gather(yy, xx):
        return jax.vmap(lambda ib, yb, xb: ib[yb, xb])(im, yy, xx)

    Ia, Ib, Ic, Id = gather(y0, x0), gather(y1, x0), gather(y0, x1), gather(y1, x1)
    dxw = x1.astype(jnp.float32) - x
    dyw = y1.astype(jnp.float32) - y
    wa = (dxw * dyw)[..., None]
    wb = (dxw * (1 - dyw))[..., None]
    wc = ((1 - dxw) * dyw)[..., None]
    wd = ((1 - dxw) * (1 - dyw))[..., None]
    out = wa * Ia + wb * Ib + wc * Ic + wd * Id
    return out.reshape(B, H, W, C)


if __name__ == "__main__":
    key = jax.random.PRNGKey(0)
    k1, k2 = jax.random.split(key)
    B, H, W, C = 2, 16, 16, 4
    moving_image = jax.random.normal(k1, (B, H, W, C), dtype=jnp.float32)
    # deformation with both in-range and out-of-range displacements
    deformation_matrix = 2.5 * jax.random.normal(k2, (B, H, W, 2), dtype=jnp.float32)

    out = jax.block_until_ready(spatial_transformation(moving_image, deformation_matrix))
    ref = jax.block_until_ready(_reference(moving_image, deformation_matrix))

    assert out.shape == (B, H, W, C) and out.dtype == jnp.float32
    np.testing.assert_allclose(np.asarray(out), np.asarray(ref), atol=1e-4, rtol=1e-4)
    print("KERNEL_OK")
</pallas_src>

<mosaic_0001>
module attributes {stable_mosaic.version = 11 : i64} {
  func.func @_stn_kernel(%arg0: i32, %arg1: i32, %arg2: memref<1x4x16x16xf32, #tpu.memory_space<vmem>>, %arg3: memref<1x1x2x256xf32, #tpu.memory_space<vmem>>, %arg4: memref<1x1x4x256xf32, #tpu.memory_space<vmem>>) attributes {dimension_semantics = [#tpu.dimension_semantics<parallel>, #tpu.dimension_semantics<arbitrary>], iteration_bounds = array<i64: 2, 1>, scalar_prefetch = 0 : i64, scratch_operands = 0 : i64, tpu.core_type = #tpu.core_type<tc>, window_params = [{transform_indices = @transform_0, window_bounds = array<i64: 1, 4, 16, 16>}, {transform_indices = @transform_1, window_bounds = array<i64: 1, 1, 2, 256>}, {transform_indices = @transform_2, window_bounds = array<i64: 1, 1, 4, 256>}]} {
    %c0 = arith.constant 0 : index
    %c0_0 = arith.constant 0 : index
    %c0_1 = arith.constant 0 : index
    %c0_2 = arith.constant 0 : index
    %0 = vector.load %arg3[%c0, %c0_0, %c0_1, %c0_2] : memref<1x1x2x256xf32, #tpu.memory_space<vmem>>, vector<1x1x2x256xf32>
    %1 = vector.shape_cast %0 : vector<1x1x2x256xf32> to vector<2x256xf32>
    %2 = vector.extract_strided_slice %1 {offsets = [0, 0], sizes = [1, 256], strides = [1, 1]} : vector<2x256xf32> to vector<1x256xf32>
    %3 = vector.extract_strided_slice %1 {offsets = [1, 0], sizes = [1, 256], strides = [1, 1]} : vector<2x256xf32> to vector<1x256xf32>
    %4 = math.floor %2 : vector<1x256xf32>
    %5 = arith.fptosi %4 : vector<1x256xf32> to vector<1x256xi32>
    %6 = math.floor %3 : vector<1x256xf32>
    %7 = arith.fptosi %6 : vector<1x256xf32> to vector<1x256xi32>
    %c0_i32 = arith.constant 0 : i32
    %c17_i32 = arith.constant 17 : i32
    %8 = vector.broadcast %c0_i32 : i32 to vector<1x256xi32>
    %9 = arith.maxsi %8, %5 : vector<1x256xi32>
    %10 = vector.broadcast %c17_i32 : i32 to vector<1x256xi32>
    %11 = arith.minsi %10, %9 : vector<1x256xi32>
    %c1_i32 = arith.constant 1 : i32
    %12 = vector.broadcast %c1_i32 : i32 to vector<1x256xi32>
    %13 = arith.addi %5, %12 : vector<1x256xi32>
    %c0_i32_3 = arith.constant 0 : i32
    %c17_i32_4 = arith.constant 17 : i32
    %14 = vector.broadcast %c0_i32_3 : i32 to vector<1x256xi32>
    %15 = arith.maxsi %14, %13 : vector<1x256xi32>
    %16 = vector.broadcast %c17_i32_4 : i32 to vector<1x256xi32>
    %17 = arith.minsi %16, %15 : vector<1x256xi32>
    %c0_i32_5 = arith.constant 0 : i32
    %c17_i32_6 = arith.constant 17 : i32
    %18 = vector.broadcast %c0_i32_5 : i32 to vector<1x256xi32>
    %19 = arith.maxsi %18, %7 : vector<1x256xi32>
    %20 = vector.broadcast %c17_i32_6 : i32 to vector<1x256xi32>
    %21 = arith.minsi %20, %19 : vector<1x256xi32>
    %c1_i32_7 = arith.constant 1 : i32
    %22 = vector.broadcast %c1_i32_7 : i32 to vector<1x256xi32>
    %23 = arith.addi %7, %22 : vector<1x256xi32>
    %c0_i32_8 = arith.constant 0 : i32
    %c17_i32_9 = arith.constant 17 : i32
    %24 = vector.broadcast %c0_i32_8 : i32 to vector<1x256xi32>
    %25 = arith.maxsi %24, %23 : vector<1x256xi32>
    %26 = vector.broadcast %c17_i32_9 : i32 to vector<1x256xi32>
    %27 = arith.minsi %26, %25 : vector<1x256xi32>
    %28 = arith.sitofp %17 : vector<1x256xi32> to vector<1x256xf32>
    %29 = arith.subf %28, %2 : vector<1x256xf32>
    %30 = arith.sitofp %27 : vector<1x256xi32> to vector<1x256xf32>
    %31 = arith.subf %30, %3 : vector<1x256xf32>
    %32 = tpu.iota {dimensions = array<i32: 0>} : vector<16x256xi32>
    %c1_i32_10 = arith.constant 1 : i32
    %33 = vector.broadcast %c1_i32_10 : i32 to vector<16x256xi32>
    %34 = arith.addi %32, %33 : vector<16x256xi32>
    %35 = vector.broadcast %11 : vector<1x256xi32> to vector<16x256xi32>
    %36 = arith.cmpi eq, %34, %35 : vector<16x256xi32>
    %cst = arith.constant 0.000000e+00 : f32
    %37 = vector.shape_cast %29 : vector<1x256xf32> to vector<1x256xf32>
    %38 = vector.broadcast %37 : vector<1x256xf32> to vector<16x256xf32>
    %39 = vector.broadcast %cst : f32 to vector<16x256xf32>
    %40 = arith.select %36, %38, %39 : vector<16x256xi1>, vector<16x256xf32>
    %41 = vector.broadcast %17 : vector<1x256xi32> to vector<16x256xi32>
    %42 = arith.cmpi eq, %34, %41 : vector<16x256xi32>
    %cst_11 = arith.constant 1.000000e+00 : f32
    %43 = vector.broadcast %cst_11 : f32 to vector<1x256xf32>
    %44 = arith.subf %43, %29 : vector<1x256xf32>
    %cst_12 = arith.constant 0.000000e+00 : f32
    %45 = vector.shape_cast %44 : vector<1x256xf32> to vector<1x256xf32>
    %46 = vector.broadcast %45 : vector<1x256xf32> to vector<16x256xf32>
    %47 = vector.broadcast %cst_12 : f32 to vector<16x256xf32>
    %48 = arith.select %42, %46, %47 : vector<16x256xi1>, vector<16x256xf32>
    %49 = arith.addf %40, %48 : vector<16x256xf32>
    %50 = tpu.iota {dimensions = array<i32: 0>} : vector<16x256xi32>
    %c1_i32_13 = arith.constant 1 : i32
    %51 = vector.broadcast %c1_i32_13 : i32 to vector<16x256xi32>
    %52 = arith.addi %50, %51 : vector<16x256xi32>
    %53 = vector.broadcast %21 : vector<1x256xi32> to vector<16x256xi32>
    %54 = arith.cmpi eq, %52, %53 : vector<16x256xi32>
    %cst_14 = arith.constant 0.000000e+00 : f32
    %55 = vector.shape_cast %31 : vector<1x256xf32> to vector<1x256xf32>
    %56 = vector.broadcast %55 : vector<1x256xf32> to vector<16x256xf32>
    %57 = vector.broadcast %cst_14 : f32 to vector<16x256xf32>
    %58 = arith.select %54, %56, %57 : vector<16x256xi1>, vector<16x256xf32>
    %59 = vector.broadcast %27 : vector<1x256xi32> to vector<16x256xi32>
    %60 = arith.cmpi eq, %52, %59 : vector<16x256xi32>
    %cst_15 = arith.constant 1.000000e+00 : f32
    %61 = vector.broadcast %cst_15 : f32 to vector<1x256xf32>
    %62 = arith.subf %61, %31 : vector<1x256xf32>
    %cst_16 = arith.constant 0.000000e+00 : f32
    %63 = vector.shape_cast %62 : vector<1x256xf32> to vector<1x256xf32>
    %64 = vector.broadcast %63 : vector<1x256xf32> to vector<16x256xf32>
    %65 = vector.broadcast %cst_16 : f32 to vector<16x256xf32>
    %66 = arith.select %60, %64, %65 : vector<16x256xi1>, vector<16x256xf32>
    %67 = arith.addf %58, %66 : vector<16x256xf32>
    %c0_17 = arith.constant 0 : index
    %c0_18 = arith.constant 0 : index
    %c0_19 = arith.constant 0 : index
    %c0_20 = arith.constant 0 : index
    %68 = vector.load %arg2[%c0_17, %c0_18, %c0_19, %c0_20] : memref<1x4x16x16xf32, #tpu.memory_space<vmem>>, vector<1x4x16x16xf32>
    %69 = vector.shape_cast %68 : vector<1x4x16x16xf32> to vector<4x16x16xf32>
    %70 = vector.shape_cast %69 : vector<4x16x16xf32> to vector<64x16xf32>
    %cst_21 = arith.constant dense<0.000000e+00> : vector<64x256xf32>
    %71 = tpu.matmul %70, %49, %cst_21 {dimension_numbers = #tpu.dot_dimension_numbers<[1], [0], [0], [1], [0, 0, 1, 1], [], []>} : vector<64x16xf32>, vector<16x256xf32>, vector<64x256xf32> -> vector<64x256xf32>
    %72 = vector.shape_cast %71 : vector<64x256xf32> to vector<4x16x256xf32>
    %73 = vector.shape_cast %67 : vector<16x256xf32> to vector<1x16x256xf32>
    %74 = vector.broadcast %73 : vector<1x16x256xf32> to vector<4x16x256xf32>
    %75 = arith.mulf %74, %72 : vector<4x16x256xf32>
    %cst_22 = arith.constant dense<0.000000e+00> : vector<4x256xf32>
    %76 = vector.multi_reduction <add>, %75, %cst_22 [1] : vector<4x16x256xf32> to vector<4x256xf32>
    %c0_23 = arith.constant 0 : index
    %c0_24 = arith.constant 0 : index
    %c0_25 = arith.constant 0 : index
    %c0_26 = arith.constant 0 : index
    %77 = vector.load %arg4[%c0_23, %c0_24, %c0_25, %c0_26] : memref<1x1x4x256xf32, #tpu.memory_space<vmem>>, vector<1x1x4x256xf32>
    %78 = vector.shape_cast %77 : vector<1x1x4x256xf32> to vector<4x256xf32>
    %79 = vector.shape_cast %76 : vector<4x256xf32> to vector<1x1x4x256xf32>
    tpu.vector_store %arg4[%c0_23, %c0_24, %c0_25, %c0_26], %79 {strides = array<i32>} : memref<1x1x4x256xf32, #tpu.memory_space<vmem>>, vector<1x1x4x256xf32>,
    return
  }
  func.func @transform_0(%arg0: i32, %arg1: i32) -> (i32, i32, i32, i32) {
    %c0_i32 = arith.constant 0 : i32
    %c0_i32_0 = arith.constant 0 : i32
    %c0_i32_1 = arith.constant 0 : i32
    %c0_i32_2 = arith.constant 0 : i32
    return %arg0, %c0_i32, %c0_i32_0, %c0_i32_1 : i32, i32, i32, i32
  }
  func.func @transform_1(%arg0: i32, %arg1: i32) -> (i32, i32, i32, i32) {
    %c0_i32 = arith.constant 0 : i32
    %c0_i32_0 = arith.constant 0 : i32
    %c0_i32_1 = arith.constant 0 : i32
    return %arg0, %arg1, %c0_i32, %c0_i32_0 : i32, i32, i32, i32
  }
  func.func @transform_2(%arg0: i32, %arg1: i32) -> (i32, i32, i32, i32) {
    %c0_i32 = arith.constant 0 : i32
    %c0_i32_0 = arith.constant 0 : i32
    %c0_i32_1 = arith.constant 0 : i32
    return %arg0, %arg1, %c0_i32, %c0_i32_0 : i32, i32, i32, i32
  }
}

</mosaic_0001>

<bundles_post_ra>
// kernel: tpu_custom_call.1
= control target key start
LH: loop header
LB: loop body
LE: loop exit
PB: predicated region body
PF: predicated region fallthrough
CT: control target
= control target key end

     0   :  { %7 = vsyncpa [#allocation3], 0  ;;  %s1305_s0 = inlined_call_operand.hbm [shape: f32[2,4,16,16], index: 0, kind: input, shape index: {}]   ;;  %s1306_s1 = inlined_call_operand.hbm [shape: f32[2,1,2,256], index: 1, kind: input, shape index: {}]   ;;  %s1307_s2 = inlined_call_operand.hbm [shape: f32[2,1,4,256], index: 2, kind: output, shape index: {}]  }
   0x1   :  { %9 = vsyncpa [#allocation3 + $0x1], 0 }
   0x2   :  { %10 = vsyncpa [#allocation6], 0 }
   0x3   :  { %12 = vsyncpa [#allocation6 + $0x1], 0 }
   0x4   :  { %13 = vsyncpa [#allocation4], 0 }
   0x5   :  { %15 = vsyncpa [#allocation4 + $0x1], 0  ;;  %s1056_s9 = smov 0   ;;  %s1058_s10 = smov 0  }
   0x6   :  { %s1060_s11 = smov 0   ;;  %s1062_s12 = smov 0  }
   0x7   :  { %s1064_s13 = smov 0   ;;  %s1066_s14 = smov 0  }
   0x8 LB: > { %s787_s15 = sadd.s32 4294967295, %s1033_s14   ;;  %s788_s16 = sadd.s32 4294967294, %s1033_s14   ;;  %s1033_s14 = sphi %s1066_s14, %s21_s14   ;;  %s1029_s13 = sphi %s1064_s13, %s1318_s13   ;;  %s1025_s12 = sphi %s1062_s12, %s1317_s12   ;;  %s1021_s11 = sphi %s1060_s11, %s1316_s11   ;;  %s1017_s10 = sphi %s1058_s10, %s1315_s10   ;;  %s1013_s9 = sphi %s1056_s9, %s1314_s9  }
   0x9   : > { %s33_s17 = sadd.s32 1, %s1029_s13  ;;  %s40_s18 = sadd.s32 1, %s1021_s11 }
   0xa   : > { %p35_p0 = scmp.ge.s32.totalorder %s33_s17, 2  ;;  %p47_p1 = scmp.ne.s32.totalorder %s1021_s11, %s1017_s10 }
   0xb   : > { %p48_p2 = scmp.eq.s32.totalorder %s1033_s14, 0  ;;  %p53_p3 = scmp.ne.s32.totalorder %s1017_s10, %s1013_s9 }
   0xc   : > { %s1320_s17 = smov (%p35_p0, %s33_s17), 0  ;;  %p54_p5 = scmp.eq.s32.totalorder %s787_s15, 0 }
   0xd   : > { %p1097_p4 = por %p48_p2, %p47_p1  ;;  %s37_s20 = ssub.s32 %s1029_s13, %s1320_s17 }
   0xe   : > { %p107_p6 = scmp.eq.s32.totalorder %s787_s15, 1  ;;  %p38_p7 = scmp.eq.s32.totalorder %s37_s20, 0 }
   0xf   : > { %p1103_p8 = por %p54_p5, %p53_p3  ;;  %p113_p10 = scmp.eq.s32.totalorder %s788_s16, 1 }
  0x10   : > { %p1107_p9 = por %p107_p6, %p47_p1  ;;  %p790_p12 = scmp.ge.s32.totalorder %s1033_s14, 2 }
  0x11   : > { %s1112_s23 = scalar_select %p38_p7, %s1021_s11, %s40_s18  }
  0x12   : > { %p1114_p11 = por %p113_p10, %p53_p3  ;;  %p840_p13 = scmp.lt.s32.totalorder %s1033_s14, 2 }
  0x13   : > { %s1121_s25 = sand.u32 1, %s1021_s11   ;;  %s814_s27 = sshll.u32 %s1029_s13, 10 }
  0x14   : > { %s791_s26 = sshll.u32 %s1121_s25, 6  ;;  %s143_s30 = scalar_lea.hbm %s1305_s0, %s814_s27 }
  0x15   : > { %s137_s3 = scalar_lea.vmem [#allocation2], %s791_s26  ;;  %p1130_p0 = pnand %p840_p13, %p1097_p4 }
  0x16   : > { %s144_s4 = sshll.u32 %s137_s3, 4  ;;  %p797_p1 = scmp.ge.s32.totalorder %s1033_s14, 1  ;;  %s145_s4 = int_to_ptr.vmem [resolvable:$true] %s144_s4 }
  0x17   : > { %s134_s6 = scalar_lea.sflag [#allocation3], %s1121_s25  ;;  %p895_p2 = pneg %p1130_p0 }
  0x18   : > { %s906_s7 = scalar_lea.vmem %s145_s4, 1024  ;;  %s1035_s8 = smov [#allocation2]  }
  0x19   : > { %p907_p3 = scmp.ne.s32.totalorder %s145_s4, %s906_s7  ;;  %s911_s15 = sshll.u32 %s1035_s8, 4  ;;  %s912_s15 = int_to_ptr.vmem [resolvable:$false] %s911_s15 }
  0x1a   : > { %s913_s16 = scalar_lea.vmem %s912_s15, 2048  ;;  %p914_p4 = scmp.lt.s32.totalorder %s145_s4, %s912_s15 }
  0x1b   : > { %p909_p5 = pnand %p907_p3, %p895_p2  ;;  %p915_p7 = scmp.lt.s32.totalorder %s913_s16, %s906_s7 }
  0x1d   : > { %p910_p6 = pneg %p909_p5  ;;  %p916_p10 = por %p915_p7, %p914_p4 }
  0x1f   : > { %p917_p13 = pnand %p916_p10, %p910_p6 }
  0x21   : > { %920 = shalt.err (!%p917_p13)
}
  0x22   : > { %s1036_s18 = smov 128   ;;  %s1037_s19 = smov 8  }
  0x23   : > { %832 = dma.hbm_to_vmem [thread:$0]  (!%p1130_p0), %s143_s30, 1024, %s145_s4, %s134_s6, %s1036_s18, %s1036_s18, %s1037_s19  }
  0x24   : > { %p173_p3 = scmp.lt.s32.totalorder %s1033_s14, 3  ;;  %s794_s20 = sshll.u32 %s1121_s25, 2 }
  0x25   : > { %s815_s26 = sshll.u32 %s1029_s13, 6  ;;  %s158_s7 = scalar_lea.vmem [#allocation5], %s794_s20 }
  0x26   : > { %p1148_p5 = pnand %p797_p1, %p173_p3  ;;  %s166_s3 = scalar_lea.hbm %s1306_s1, %s815_s26 }
  0x27   : > { %s168_s8 = sshll.u32 %s158_s7, 4  ;;  %s155_s15 = scalar_lea.sflag [#allocation6], %s1121_s25  ;;  %s169_s8 = int_to_ptr.vmem [resolvable:$true] %s168_s8 }
  0x28   : > { %s934_s16 = scalar_lea.vmem %s169_s8, 64  ;;  %s1038_s30 = smov [#allocation5]  }
  0x29   : > { %p935_p6 = scmp.ne.s32.totalorder %s169_s8, %s934_s16  ;;  %s939_s4 = sshll.u32 %s1038_s30, 4  ;;  %s940_s4 = int_to_ptr.vmem [resolvable:$false] %s939_s4 }
  0x2a   : > { %s941_s6 = scalar_lea.vmem %s940_s4, 128  ;;  %p942_p1 = scmp.lt.s32.totalorder %s169_s8, %s940_s4 }
  0x2b   : > { %p937_p4 = pnand %p935_p6, %p895_p2  ;;  %p943_p10 = scmp.lt.s32.totalorder %s941_s6, %s934_s16 }
  0x2d   : > { %p938_p7 = pneg %p937_p4  ;;  %p944_p13 = por %p943_p10, %p942_p1 }
  0x2f   : > { %p945_p3 = pnand %p944_p13, %p938_p7 }
  0x31   : > { %948 = shalt.err (!%p945_p3)
}
  0x32   : > { %835 = dma.hbm_to_vmem [thread:$0]  (!%p1130_p0), %s166_s3, 64, %s169_s8, %s155_s15  }
  0x33   : > { %177 = sbr.rel (%p1148_p5) target bundleno = 336 (0x150), region = 28  ;;  %s1164_s25 = sand.u32 (!%p1148_p5), 1, %s1017_s10  }
  0x34   : > { %s798_s18 = sshll.u32 (!%p1148_p5), %s1164_s25, 6  ;;  %s180_s19 = scalar_lea.sflag (!%p1148_p5), [#allocation3], %s1164_s25 }
  0x35   : > { %s1168_s20 = scalar_lea.vmem (!%p1148_p5), [#allocation2], %s798_s18 }
  0x38   : > { %1000 = dma.done.wait (%p1103_p8), %s180_s19, 1024  }
  0x39   : > { %1002 = vsyncadd (%p1103_p8), %s180_s19, 4294966272  ;;  %s799_s5 = sshll.u32 %s1164_s25, 2  ;;  %s189_s26 = scalar_lea.sflag [#allocation6], %s1164_s25 }
  0x3a   : > { %s192_s27 = scalar_lea.vmem [#allocation5], %s799_s5 }
  0x3b   : > { %1004 = dma.done.wait (%p1103_p8), %s189_s26, 64  }
  0x3c   : > { %1006 = vsyncadd (%p1103_p8), %s189_s26, 4294967232  ;;  %v1039_v0 = vmov 0.0   ;;  %v232_v1 = vlaneseq  ;;  %v218_v2 = vld [vmem:[%s192_s27] sm:$0xf]  ;;  %vm424_vm12 = vcmask 130048   ;;  %v417_v50 = vld [vmem:[%s1168_s20 + $0x8] sm:$0xff] }
  0x3d   : > { %513 = vmatprep.mubr.f32.mxu0 %v1039_v0  ;;  %537 = vmatprep.mubr.f32.mxu1 %v1039_v0  ;;  %v219_v3 = vfloor.f32 %v218_v2  ;;  %v416_v48 = vld [vmem:[%s1168_s20] sm:$0xff]  ;;  %v421_v51 = vld [vmem:[%s1168_s20 + $0x28] sm:$0xff]  ;;  %v418_v52 = vld [vmem:[%s1168_s20 + $0x10] sm:$0xff]  ;;  %s800_s21 = sshll.u32 %s1164_s25, 3  ;;  %s816_s28 = sshll.u32 %s1025_s12, 7 }
  0x3e   : > { %v1182_v5 = vshrl.u32 %v232_v1, 7  ;;  %v420_v49 = vld [vmem:[%s1168_s20 + $0x20] sm:$0xff]  ;;  %v422_v53 = vld [vmem:[%s1168_s20 + $0x30] sm:$0xff]  ;;  %v419_v54 = vld [vmem:[%s1168_s20 + $0x18] sm:$0xff]  ;;  %s217_s29 = scalar_lea.vmem [#allocation7], %s800_s21  ;;  %s1263_s15 = scalar_lea.hbm %s1307_s2, %s816_s28 }
  0x3f   : > { %v821_v4 = vtrunc.f32 %v219_v3  ;;  %v423_v55 = vld [vmem:[%s1168_s20 + $0x38] sm:$0xff]  ;;  %s680_s3 = sshll.u32 %s217_s29, 4  ;;  %s664_s16 = scalar_lea.sflag [#allocation4], %s1164_s25  ;;  %s681_s3 = int_to_ptr.vmem [resolvable:$true] %s680_s3 }
  0x40   : > { %v239_v8 = vsub.s32 0, %v1182_v5  ;;  %v243_v9 = vsub.s32 2, %v1182_v5  ;;  %v234_v13 = vadd.s32 8, %v1182_v5  ;;  %v1196_v19 = vadd.s32 1, %v1182_v5  ;;  %s949_s30 = scalar_lea.vmem %s681_s3, 128  ;;  %s1040_s12 = smov [#allocation7]  }
  0x41   : > { %v822_v6 = vcvt.f32.s32 %v821_v4  ;;  %v330_v56 = vsub.s32 1, %v1182_v5  ;;  %v334_v57 = vsub.s32 3, %v1182_v5  ;;  %p950_p8 = scmp.ne.s32.totalorder %s681_s3, %s949_s30  ;;  %s953_s4 = sshll.u32 %s1040_s12, 4  ;;  %s954_s4 = int_to_ptr.vmem [resolvable:$false] %s953_s4 }
  0x42   : > { %v1198_v20 = vadd.s32 1, %v234_v13  ;;  %s955_s6 = scalar_lea.vmem %s954_s4, 256  ;;  %p956_p5 = scmp.lt.s32.totalorder %s681_s3, %s954_s4 }
  0x43   : > { %vm221_vm0 = vcmp.gt.s32.totalorder %v822_v6, 0  ;;  %v225_v7 = vadd.s32 1, %v822_v6  ;;  %p951_p0 = pnand %p950_p8, %p1107_p9  ;;  %p957_p6 = scmp.lt.s32.totalorder %s955_s6, %s949_s30 }
  0x44   : > { %v222_v10 = vsel %vm221_vm0, %v822_v6, 0 }
  0x45   : > { %vm223_vm1 = vcmp.lt.s32.totalorder %v222_v10, 17  ;;  %vm226_vm2 = vcmp.gt.s32.totalorder %v225_v7, 0  ;;  %p952_p2 = pneg %p951_p0  ;;  %p958_p4 = por %p957_p6, %p956_p5 }
  0x46   : > { %v1186_v11 = vsel %vm223_vm1, %v222_v10, 17  ;;  %v227_v12 = vsel %vm226_vm2, %v225_v7, 0 }
  0x47   : > { %vm228_vm3 = vcmp.lt.s32.totalorder %v227_v12, 17  ;;  %v244_v14 = vrot.slane %v1186_v11, %v243_v9  ;;  %v240_v15 = vrot.slane %v1186_v11, %v239_v8  ;;  %v331_v58 = vrot.slane %v1186_v11, %v330_v56  ;;  %p959_p7 = pnand %p958_p4, %p952_p2 }
  0x48   : > { %v1191_v16 = vsel %vm228_vm3, %v227_v12, 17  ;;  %v335_v60 = vrot.slane %v1186_v11, %v334_v57 }
  0x49   : > { %v230_v17 = vcvt.s32.f32 %v1191_v16  ;;  %v287_v18 = vrot.slane %v1191_v16, %v243_v9  ;;  %v252_v21 = vrot.slane %v244_v14, %v239_v8  ;;  %v248_v22 = vrot.slane %v240_v15, %v239_v8 }
  0x4a   : > { %v283_v23 = vrot.slane %v1191_v16, %v239_v8  ;;  %v373_v59 = vrot.slane %v1191_v16, %v330_v56  ;;  %v377_v61 = vrot.slane %v1191_v16, %v334_v57  ;;  %v339_v62 = vrot.slane %v331_v58, %v330_v56 }
  0x4b   : > { %v1201_v24 = vsub.f32 %v230_v17, %v218_v2  ;;  %v295_v25 = vrot.slane %v287_v18, %v239_v8  ;;  %vm256_vm4 = vcmp.eq.s32.totalorder %v1198_v20, %v252_v21  ;;  %vm255_vm5 = vcmp.eq.s32.totalorder %v1198_v20, %v248_v22 }
  0x4c   : > { %v291_v26 = vrot.slane %v283_v23, %v239_v8  ;;  %vm254_vm6 = vcmp.eq.s32.totalorder %v1196_v19, %v252_v21  ;;  %vm253_vm7 = vcmp.eq.s32.totalorder %v1196_v19, %v248_v22  ;;  %v343_v4 = vrot.slane %v335_v60, %v330_v56 }
  0x4d   : > { %v265_v27 = vrot.slane %v1201_v24, %v243_v9  ;;  %v1205_v28 = vsub.f32 1.0, %v1201_v24  ;;  %v261_v29 = vrot.slane %v1201_v24, %v239_v8  ;;  %vm299_vm8 = vcmp.eq.s32.totalorder %v1198_v20, %v295_v25 }
  0x4e   : > { %vm298_vm9 = vcmp.eq.s32.totalorder %v1198_v20, %v291_v26  ;;  %vm297_vm10 = vcmp.eq.s32.totalorder %v1196_v19, %v295_v25  ;;  %vm296_vm11 = vcmp.eq.s32.totalorder %v1196_v19, %v291_v26  ;;  %v351_v63 = vrot.slane %v1201_v24, %v330_v56 }
  0x4f   : > { %v275_v30 = vrot.slane %v265_v27, %v239_v8  ;;  %v309_v31 = vrot.slane %v1205_v28, %v243_v9  ;;  %v271_v32 = vrot.slane %v261_v29, %v239_v8  ;;  %v305_v33 = vrot.slane %v1205_v28, %v239_v8 }
  0x50   : > { %v393_v1 = vrot.slane %v1205_v28, %v330_v56  ;;  %v355_v2 = vrot.slane %v1201_v24, %v334_v57  ;;  %v397_v3 = vrot.slane %v1205_v28, %v334_v57  ;;  %v385_v5 = vrot.slane %v377_v61, %v330_v56 }
  0x51   : > { %v279_v34 = vsel %vm256_vm4, %v275_v30, 0.0  ;;  %v319_v35 = vrot.slane %v309_v31, %v239_v8  ;;  %v278_v36 = vsel %vm255_vm5, %v271_v32, 0.0  ;;  %v315_v37 = vrot.slane %v305_v33, %v239_v8 }
  0x52   : > { %v277_v38 = vsel %vm254_vm6, %v275_v30, 0.0  ;;  %v276_v39 = vsel %vm253_vm7, %v271_v32, 0.0  ;;  %vm344_vm13 = vcmp.eq.s32.totalorder %v1196_v19, %v339_v62  ;;  %v361_v6 = vrot.slane %v351_v63, %v330_v56 }
  0x53   : > { %v323_v40 = vsel %vm299_vm8, %v319_v35, 0.0  ;;  %v322_v41 = vsel %vm298_vm9, %v315_v37, 0.0  ;;  %v321_v42 = vsel %vm297_vm10, %v319_v35, 0.0  ;;  %v320_v43 = vsel %vm296_vm11, %v315_v37, 0.0 }
  0x54   : > { %v327_v44 = vadd.f32 %v323_v40, %v279_v34  ;;  %v326_v45 = vadd.f32 %v322_v41, %v278_v36  ;;  %v325_v46 = vadd.f32 %v321_v42, %v277_v38  ;;  %v324_v47 = vadd.f32 %v320_v43, %v276_v39 }
  0x55   : > { %v403_v7 = vrot.slane %v393_v1, %v330_v56  ;;  %v365_v8 = vrot.slane %v355_v2, %v330_v56  ;;  %v407_v9 = vrot.slane %v397_v3, %v330_v56  ;;  %vm346_vm15 = vcmp.eq.s32.totalorder %v1198_v20, %v339_v62 }
  0x56   : > { %477 = vmatprep.subr.mxu0 %v327_v44  ;;  %817 = vmatprep.subr.mxu1 %v327_v44  ;;  %vm345_vm1 = vcmp.eq.s32.totalorder %v1196_v19, %v343_v4  ;;  %vm387_vm2 = vcmp.eq.s32.totalorder %v1196_v19, %v385_v5  ;;  %vm347_vm3 = vcmp.eq.s32.totalorder %v1198_v20, %v343_v4  ;;  %v366_v10 = vsel %vm344_vm13, %v361_v6, 0.0 }
  0x57   : > { %478 = vmatpush1.msra.mxu0 %v326_v45  ;;  %819 = vmatpush1.msra.mxu1 %v326_v45  ;;  %vm389_vm4 = vcmp.eq.s32.totalorder %v1198_v20, %v385_v5  ;;  %v368_v12 = vsel %vm346_vm15, %v361_v6, 0.0  ;;  %v367_v14 = vsel %vm345_vm1, %v365_v8, 0.0  ;;  %v409_v15 = vsel %vm387_vm2, %v407_v9, 0.0 }
  0x58   : > { %479 = vmatprep.subr.mxu0 %v325_v46  ;;  %818 = vmatprep.subr.mxu1 %v325_v46  ;;  %v369_v18 = vsel %vm347_vm3, %v365_v8, 0.0  ;;  %v411_v21 = vsel %vm389_vm4, %v407_v9, 0.0  ;;  %v413_v24 = vadd.f32 %v409_v15, %v367_v14  ;;  %vm647_vm5 = vcmask 1041409  }
  0x59   : > { %480 = vmatpush1.msra.mxu0 %v324_v47  ;;  %820 = vmatpush1.msra.mxu1 %v324_v47  ;;  %v415_v27 = vadd.f32 %v411_v21, %v369_v18  ;;  %vm649_vm6 = vcmask 1045509   ;;  %vm652_vm7 = vcmask 1042434   ;;  %vm654_vm8 = vcmask 1046534  }
  0x5a   : > { %801 = vmatmul.mubr.msk.f32.vlgmr.msra.gmra.mxu0 %vm424_vm12, %v416_v48  ;;  %805 = vmatmul.mubr.msk.f32.vlgmr.msra.gmra.mxu1 %vm424_vm12, %v420_v49  ;;  %vm657_vm9 = vcmask 1043459   ;;  %vm659_vm10 = vcmask 1047559  }
  0x5b   : > { %519 = vmatprep.mubr.f32.mxu0 %v1039_v0  ;;  %543 = vmatprep.mubr.f32.mxu1 %v1039_v0 }
  0x5e   : > { %802 = vmatmul.mubr.msk.f32.gmra.mxu0 %vm424_vm12, %v417_v50  ;;  %806 = vmatmul.mubr.msk.f32.gmra.mxu1 %vm424_vm12, %v421_v51 }
  0x5f   : > { %525 = vmatprep.mubr.f32.mxu0 %v1039_v0  ;;  %549 = vmatprep.mubr.f32.mxu1 %v1039_v0 }
  0x62   : > { %803 = vmatmul.mubr.msk.f32.gmra.mxu0 %vm424_vm12, %v418_v52  ;;  %807 = vmatmul.mubr.msk.f32.gmra.mxu1 %vm424_vm12, %v422_v53 }
  0x63   : > { %531 = vmatprep.mubr.f32.mxu0 %v1039_v0  ;;  %555 = vmatprep.mubr.f32.mxu1 %v1039_v0  ;;  %v381_v0 = vrot.slane %v373_v59, %v330_v56 }
  0x65   : > { %vm386_vm14 = vcmp.eq.s32.totalorder %v1196_v19, %v381_v0  ;;  %vm388_vm0 = vcmp.eq.s32.totalorder %v1198_v20, %v381_v0 }
  0x66   : > { %804 = vmatmul.mubr.msk.f32.gmra.mxu0 %vm424_vm12, %v419_v54  ;;  %808 = vmatmul.mubr.msk.f32.gmra.mxu1 %vm424_vm12, %v423_v55  ;;  %v408_v11 = vsel %vm386_vm14, %v403_v7, 0.0  ;;  %v410_v13 = vsel %vm388_vm0, %v403_v7, 0.0 }
  0x67   : > { %v412_v22 = vadd.f32 %v408_v11, %v366_v10  ;;  %v414_v23 = vadd.f32 %v410_v13, %v368_v12 }
 0x11a   : > { %v515_v16 = vpop.f32.mrf.mxu0  ;;  %v539_v17 = vpop.f32.mrf.mxu1 }
 0x11b   : > { %v570_v19 = vmul.f32 %v539_v17, %v412_v22  ;;  %v562_v20 = vmul.f32 %v515_v16, %v412_v22 }
 0x11c   : > { %v517_v25 = vpop.f32.mrf.mxu0  ;;  %v541_v26 = vpop.f32.mrf.mxu1 }
 0x11d   : > { %v563_v32 = vmul.f32 %v517_v25, %v413_v24  ;;  %v571_v33 = vmul.f32 %v541_v26, %v413_v24 }
 0x11e   : > { %v521_v28 = vpop.f32.mrf.mxu0  ;;  %v545_v29 = vpop.f32.mrf.mxu1 }
 0x11f   : > { %v564_v30 = vmul.f32 %v521_v28, %v414_v23  ;;  %v572_v31 = vmul.f32 %v545_v29, %v414_v23 }
 0x120   : > { %v523_v34 = vpop.f32.mrf.mxu0  ;;  %v547_v35 = vpop.f32.mrf.mxu1 }
 0x121   : > { %v578_v36 = vadd.f32 %v564_v30, %v562_v20  ;;  %v606_v37 = vadd.f32 %v572_v31, %v570_v19  ;;  %v565_v38 = vmul.f32 %v523_v34, %v415_v27  ;;  %v573_v39 = vmul.f32 %v547_v35, %v415_v27 }
 0x122   : > { %v527_v40 = vpop.f32.mrf.mxu0  ;;  %v551_v41 = vpop.f32.mrf.mxu1 }
 0x123   : > { %v607_v42 = vrot.slane %v606_v37, 4  ;;  %v585_v43 = vadd.f32 %v565_v38, %v563_v32  ;;  %v613_v44 = vadd.f32 %v573_v39, %v571_v33  ;;  %v579_v47 = vrot.slane %v578_v36, 4 }
 0x124   : > { %v529_v45 = vpop.f32.mrf.mxu0  ;;  %v553_v46 = vpop.f32.mrf.mxu1  ;;  %v574_v50 = vmul.f32 %v551_v41, %v412_v22  ;;  %v566_v56 = vmul.f32 %v527_v40, %v412_v22 }
 0x125   : > { %v586_v48 = vrot.slane %v585_v43, 4  ;;  %v614_v49 = vrot.slane %v613_v44, 4  ;;  %v608_v53 = vadd.f32 %v607_v42, %v606_v37  ;;  %v580_v61 = vadd.f32 %v579_v47, %v578_v36 }
 0x126   : > { %v533_v51 = vpop.f32.mrf.mxu0  ;;  %v557_v52 = vpop.f32.mrf.mxu1  ;;  %v567_v63 = vmul.f32 %v529_v45, %v413_v24  ;;  %v575_v0 = vmul.f32 %v553_v46, %v413_v24 }
 0x127   : > { %v587_v54 = vadd.f32 %v586_v48, %v585_v43  ;;  %v615_v55 = vadd.f32 %v614_v49, %v613_v44  ;;  %v568_v57 = vmul.f32 %v533_v51, %v414_v23  ;;  %v576_v58 = vmul.f32 %v557_v52, %v414_v23 }
 0x128   : > { %v535_v59 = vpop.f32.mrf.mxu0  ;;  %v559_v60 = vpop.f32.mrf.mxu1  ;;  %v609_v5 = vrot.slane %v608_v53, 2  ;;  %v581_v11 = vrot.slane %v580_v61, 2 }
 0x129   : > { %v616_v62 = vrot.slane %v615_v55, 2  ;;  %v592_v1 = vadd.f32 %v568_v57, %v566_v56  ;;  %v620_v2 = vadd.f32 %v576_v58, %v574_v50  ;;  %v569_v3 = vmul.f32 %v535_v59, %v415_v27 }
 0x12a   : > { %v577_v4 = vmul.f32 %v559_v60, %v415_v27  ;;  %v588_v6 = vrot.slane %v587_v54, 2  ;;  %v610_v17 = vadd.f32 %v609_v5, %v608_v53  ;;  %v582_v25 = vadd.f32 %v581_v11, %v580_v61 }
 0x12b   : > { %v593_v7 = vrot.slane %v592_v1, 4  ;;  %v621_v8 = vrot.slane %v620_v2, 4  ;;  %v599_v9 = vadd.f32 %v569_v3, %v567_v63  ;;  %v617_v12 = vadd.f32 %v616_v62, %v615_v55 }
 0x12c   : > { %v627_v10 = vadd.f32 %v577_v4, %v575_v0  ;;  %v589_v18 = vadd.f32 %v588_v6, %v587_v54  ;;  %v611_v20 = vrot.slane %v610_v17, 1  ;;  %v583_v34 = vrot.slane %v582_v25, 1 }
 0x12d   : > { %v594_v13 = vadd.f32 %v593_v7, %v592_v1  ;;  %v622_v14 = vadd.f32 %v621_v8, %v620_v2  ;;  %v600_v15 = vrot.slane %v599_v9, 4  ;;  %v618_v26 = vrot.slane %v617_v12, 1 }
 0x12e   : > { %v628_v16 = vrot.slane %v627_v10, 4  ;;  %v590_v30 = vrot.slane %v589_v18, 1  ;;  %v612_v39 = vadd.f32 %v611_v20, %v610_v17  ;;  %v584_v44 = vadd.f32 %v583_v34, %v582_v25 }
 0x12f   : > { %v595_v21 = vrot.slane %v594_v13, 2  ;;  %v623_v22 = vrot.slane %v622_v14, 2  ;;  %v601_v23 = vadd.f32 %v600_v15, %v599_v9  ;;  %v619_v35 = vadd.f32 %v618_v26, %v617_v12 }
 0x130   : > { %v629_v24 = vadd.f32 %v628_v16, %v627_v10  ;;  %v591_v40 = vadd.f32 %v590_v30, %v589_v18 }
 0x131   : > { %v596_v19 = vadd.f32 %v595_v21, %v594_v13  ;;  %v624_v27 = vadd.f32 %v623_v22, %v622_v14  ;;  %v602_v28 = vrot.slane %v601_v23, 2  ;;  %v644_v45 = vcombine.low %v612_v39, %v619_v35 }
 0x132   : > { %v630_v29 = vrot.slane %v629_v24, 2  ;;  %v642_v48 = vcombine.low %v584_v44, %v591_v40 }
 0x133   : > { %v597_v31 = vrot.slane %v596_v19, 1  ;;  %v603_v32 = vadd.f32 %v602_v28, %v601_v23  ;;  %v625_v36 = vrot.slane %v624_v27, 1  ;;  %v651_v51 = vrot.slane %v644_v45, 6 }
 0x134   : > { %v631_v33 = vadd.f32 %v630_v29, %v629_v24 }
 0x135   : > { %v604_v37 = vrot.slane %v603_v32, 1  ;;  %v598_v41 = vadd.f32 %v597_v31, %v596_v19  ;;  %v626_v46 = vadd.f32 %v625_v36, %v624_v27 }
 0x136   : > { %v632_v38 = vrot.slane %v631_v33, 1 }
 0x137   : > { %v605_v42 = vadd.f32 %v604_v37, %v603_v32 }
 0x138   : > { %v633_v43 = vadd.f32 %v632_v38, %v631_v33 }
 0x139   : > { %v643_v47 = vcombine.low %v598_v41, %v605_v42 }
 0x13a   : > { %v645_v50 = vcombine.low %v626_v46, %v633_v43 }
 0x13b   : > { %v646_v49 = vrot.slane %v643_v47, 7 }
 0x13c   : > { %v656_v54 = vrot.slane %v645_v50, 5 }
 0x13d   : > { %v648_v52 = vsel %vm647_vm5, %v646_v49, %v642_v48 }
 0x13e   : > { %v650_v53 = vsel %vm649_vm6, %v646_v49, %v648_v52 }
 0x13f   : > { %v653_v55 = vsel %vm652_vm7, %v651_v51, %v650_v53 }
 0x140   : > { %v655_v56 = vsel %vm654_vm8, %v651_v51, %v653_v55 }
 0x141   : > { %v658_v57 = vsel %vm657_vm9, %v656_v54, %v655_v56 }
 0x142   : > { %v660_v58 = vsel %vm659_vm10, %v656_v54, %v658_v57 }
 0x143   : > { %662 = vst [vmem:[%s217_s29] sm:$0xff] %v660_v58 }
 0x144   : > { %962 = shalt.err (!%p959_p7)
}
 0x145   : > { %s963_s18 = scalar_lea.hbm %s1263_s15, 128  ;;  %s967_s20 = scalar_lea.hbm %s1307_s2, 256 }
 0x146   : > { %p964_p1 = scmp.ne.s32.totalorder %s1263_s15, %s963_s18  ;;  %p968_p3 = scmp.lt.s32.totalorder %s1263_s15, %s1307_s2 }
 0x147   : > { %p969_p8 = scmp.lt.s32.totalorder %s967_s20, %s963_s18 }
 0x148   : > { %p965_p10 = pnand %p964_p1, %p1107_p9 }
 0x149   : > { %p970_p0 = por %p969_p8, %p968_p3 }
 0x14a   : > { %p966_p13 = pneg %p965_p10 }
 0x14c   : > { %p971_p2 = pnand %p970_p0, %p966_p13 }
 0x14e   : > { %974 = shalt.err (!%p971_p2)
}
 0x14f   : > { %827 = dma.vmem_to_hbm [thread:$0]  (%p1107_p9), %s681_s3, 128, %s1263_s15, %s664_s16  }
 0x150 PF: > { %s692_s27 = sand.u32 1, %s1013_s9   ;;  %p837_p5 = pnand %p790_p12, %p1114_p11 }
 0x151   : > { %s693_s21 = scalar_lea.sflag [#allocation4], %s692_s27 }
 0x152   : > { %p838_p6 = pneg %p837_p5 }
 0x154   : > { %1008 = dma.done.wait (%p838_p6), %s693_s21, 128  }
 0x155   : > { %1010 = vsyncadd (%p838_p6), %s693_s21, 4294967168  ;;  %s21_s14 = sadd.s32 1, %s1033_s14   ;;  %s1314_s9 = smov %s1017_s10 }
 0x156   : > { %p18_p4 = scmp.ge.s32.totalorder %s21_s14, 4   ;;  %s1315_s10 = smov %s1021_s11 }
 0x157   : > { %s1316_s11 = smov %s1112_s23  ;;  %s1317_s12 = smov %s1029_s13 }
 0x158   : > { %s1318_s13 = smov %s1320_s17  ;;  %20 = sbr.rel (!%p18_p4) target bundleno = 8 (0x8), region = 86 }
 0x15d   :  { %698 = vsyncpa [#allocation3], 1 }
 0x15e   :  { %700 = vsyncpa [#allocation3 + $0x1], 1 }
 0x15f   :  { %701 = vsyncpa [#allocation6], 1 }
 0x160   :  { %703 = vsyncpa [#allocation6 + $0x1], 1 }
 0x161   :  { %704 = vsyncpa [#allocation4], 1 }
 0x162   :  { %706 = vsyncpa [#allocation4 + $0x1], 1 }

</bundles_post_ra>
